<compile_context>
chip_gen: v7x
topology: tpu7x:2x2x1
jax: 0.10.0
libtpu: 0.0.40
codegen_flags: <defaults>
</compile_context>

<pallas_src>
import functools

import jax
import jax.numpy as jnp
from jax.experimental import pallas as pl
from jax.experimental.pallas import tpu as pltpu


def _router_gate_kernel(x_ref, w_ref, b_ref, o_ref):
    # x_ref : [tile_t, D]   (VMEM, streamed per grid step)
    # w_ref : [D, E]        (VMEM, resident: constant index_map)
    # b_ref : [1, E]        (VMEM, resident)
    # o_ref : [tile_t, E]
    logits = jnp.dot(x_ref[...], w_ref[...], preferred_element_type=jnp.float32)
    logits = logits + b_ref[...].astype(jnp.float32)
    # Numerically stable softmax over the experts (last) axis, in f32.
    m = jnp.max(logits, axis=-1, keepdims=True)
    e = jnp.exp(logits - m)                          # EUP
    denom = jnp.sum(e, axis=-1, keepdims=True)       # XLU reduce
    # Exact divide so rows sum to 1 at f32 precision (approx reciprocal is
    # only (tile_t, 1) values -> exact costs nothing in an HBM-bound kernel).
    o_ref[...] = (e / denom).astype(o_ref.dtype)


def _round_up(x, m):
    return (x + m - 1) // m * m


def _cdiv(a, b):
    return -(-a // b)


def _padded_vmem_bytes(rows, cols, itemsize):
    """VMEM footprint of a (rows, cols) block incl. lane / sublane padding."""
    sublane = max(8, 8 * (4 // itemsize))   # 8 (f32) / 16 (bf16) / 32 (int8)
    return _round_up(max(rows, 1), sublane) * _round_up(max(cols, 1), 128) * itemsize


def _vmem_config():
    """Generation-aware VMEM budget / limit (conservative fallback = v7x)."""
    try:
        cap = pltpu.get_tpu_info().vmem_capacity_bytes
    except Exception:
        cap = None
    if cap is not None and cap >= (100 << 20):
        # v5e / v6e: 128 MiB VMEM per TensorCore, single core per chip.
        return {"budget": 72 << 20, "limit": 100 << 20, "min_grid_steps": 1}
    # v7x (64 MiB per TC, 2 TCs/chip) or unknown hardware: tighter budget,
    # never request the full physical VMEM, and keep >= 2 grid steps so the
    # megacore split feeds both TensorCores.
    return {"budget": 28 << 20, "limit": 48 << 20, "min_grid_steps": 2}


def _pick_tile_t(T, D, E, x_bytes, w_bytes, out_bytes, *, x_buffers, param_buffers,
                 vmem_budget, align, min_grid_steps, max_tile=2048):
    """Largest power-of-two token tile whose padded buffers fit the budget."""
    resident = (param_buffers * _padded_vmem_bytes(D, E, w_bytes)
                + param_buffers * _padded_vmem_bytes(1, E, 4))
    tile = max_tile
    while tile > align:
        need = (resident
                + x_buffers * _padded_vmem_bytes(tile, D, x_bytes)
                + 2 * _padded_vmem_bytes(tile, E, out_bytes))
        if need <= vmem_budget:
            break
        tile //= 2
    tile = max(tile, align)
    # Never make the tile (much) larger than the token count.
    tile = min(tile, _round_up(max(T, 1), align))
    # On 2-TensorCore chips keep at least `min_grid_steps` grid steps.
    if min_grid_steps > 1 and T > align:
        tile = min(tile, _round_up(_cdiv(T, min_grid_steps), align))
    return max(tile, align)


@functools.partial(
    jax.jit,
    static_argnames=("tile_t", "out_dtype", "x_buffers", "param_buffers", "interpret"),
)
def router_gate(x, w, b, *, tile_t=None, out_dtype=jnp.float32,
                x_buffers=None, param_buffers=None, interpret=False):
    """softmax(x @ w + b, axis=-1)  (RouterGate forward).

    x: [..., model_dim]  -- streamed in its own dtype (hand in bf16 upstream
                            if you want a half-width HBM stream; no wrapper cast).
    w: [model_dim, n_experts]  (transpose of PyTorch's nn.Linear weight)
    b: [n_experts]
    -> [..., n_experts] routing probabilities (out_dtype, f32 by default so
       top-k / aux losses are not perturbed).

    x_buffers / param_buffers optionally attach pl.Buffered(n):
      * param_buffers=1 single-buffers the resident W/bias (constant index_map),
        freeing VMEM for a larger token tile at large model_dim.
      * x_buffers=3 deepens the activation pipeline if a profile shows exposed
        DMA latency (the picked tile already accounts for the buffer count).
    """
    orig_lead = x.shape[:-1]
    D = x.shape[-1]
    E = w.shape[1]
    T = 1
    for s in orig_lead:
        T *= s
    x2 = x.reshape(T, D)

    # Only the small resident weight is cast down to match a narrow activation
    # dtype; x itself is never cast here (would be an extra full HBM pass).
    if jnp.dtype(x2.dtype).itemsize < jnp.dtype(w.dtype).itemsize:
        w = w.astype(x2.dtype)
    x_bytes = jnp.dtype(x2.dtype).itemsize
    w_bytes = jnp.dtype(w.dtype).itemsize
    out_bytes = jnp.dtype(out_dtype).itemsize

    cfg = _vmem_config()
    align = 16 if x_bytes == 2 else 8          # sublane granularity of x
    if tile_t is None:
        tile_t = _pick_tile_t(
            T, D, E, x_bytes, w_bytes, out_bytes,
            x_buffers=(x_buffers or 2),
            param_buffers=(param_buffers or 2),
            vmem_budget=cfg["budget"],
            align=align,
            min_grid_steps=cfg["min_grid_steps"])

    # Ragged T: no wrapper-side pad.  cdiv grid + masked partial last block;
    # softmax is row-independent so garbage rows in that block are harmless
    # and never written back.
    grid = (_cdiv(T, tile_t),)

    def _buffered(n):
        return {} if n is None else {"pipeline_mode": pl.Buffered(n)}

    b2 = b.reshape(1, E)
    in_specs = [
        pl.BlockSpec((tile_t, D), lambda i: (i, 0), **_buffered(x_buffers)),
        pl.BlockSpec((D, E), lambda i: (0, 0), **_buffered(param_buffers)),
        pl.BlockSpec((1, E), lambda i: (0, 0), **_buffered(param_buffers)),
    ]
    # Note: a lane-dense [E, tile_t] out_spec (transpose outside) would avoid
    # masked stores when E < 128; only worth it for tiny model_dim configs.
    out_spec = pl.BlockSpec((tile_t, E), lambda i: (i, 0))

    cost = pl.CostEstimate(
        flops=2 * T * D * E,
        transcendentals=T * E,
        bytes_accessed=(T * D * x_bytes + D * E * w_bytes
                        + E * jnp.dtype(b.dtype).itemsize + T * E * out_bytes),
    )

    out = pl.pallas_call(
        _router_gate_kernel,
        out_shape=jax.ShapeDtypeStruct((T, E), out_dtype),
        grid_spec=pltpu.PrefetchScalarGridSpec(
            num_scalar_prefetch=0,
            grid=grid,
            in_specs=in_specs,
            out_specs=out_spec,
        ),
        compiler_params=pltpu.CompilerParams(
            dimension_semantics=("parallel",),
            vmem_limit_bytes=cfg["limit"],
        ),
        cost_estimate=cost,
        interpret=interpret,
    )(x2, w, b2)

    return out.reshape(orig_lead + (E,))


def _init_router_gate_params(key, model_dim, n_experts, dtype=jnp.float32):
    """Deterministic init mimicking nn.Linear default (uniform +/- 1/sqrt(fan_in))."""
    kw, kb = jax.random.split(key)
    bound = 1.0 / (model_dim ** 0.5)
    # Stored as [model_dim, n_experts] (transpose of PyTorch's [out, in]).
    w = jax.random.uniform(kw, (model_dim, n_experts), dtype, -bound, bound)
    b = jax.random.uniform(kb, (n_experts,), dtype, -bound, bound)
    return w, b


if __name__ == "__main__":
    key = jax.random.PRNGKey(0)
    kx, kp = jax.random.split(key)

    batch, seq, model_dim, n_experts = 2, 8, 32, 8
    x = jax.random.normal(kx, (batch, seq, model_dim), jnp.float32)
    w, b = _init_router_gate_params(kp, model_dim, n_experts)

    # f32 path.
    routed = router_gate(x, w, b)
    jax.block_until_ready(routed)
    ref = jax.nn.softmax(x @ w + b, axis=-1)
    assert routed.shape == (batch, seq, n_experts)
    assert jnp.allclose(routed, ref, atol=2e-3, rtol=2e-3)
    # Exact divide in the kernel -> rows sum to 1 at f32 precision.
    assert jnp.allclose(jnp.sum(routed, axis=-1), 1.0, atol=1e-3)

    # Ragged token count (T = 2*7 = 14): handled by the cdiv grid / masked
    # partial block, no wrapper-side padding pass over x.
    x_rag = jax.random.normal(kx, (2, 7, model_dim), jnp.float32)
    routed_rag = router_gate(x_rag, w, b)
    jax.block_until_ready(routed_rag)
    ref_rag = jax.nn.softmax(x_rag @ w + b, axis=-1)
    assert routed_rag.shape == (2, 7, n_experts)
    assert jnp.allclose(routed_rag, ref_rag, atol=2e-3, rtol=2e-3)

    # bf16 activation stream: the cast happens upstream (not in the wrapper);
    # only the small resident weight is cast down inside router_gate.
    routed_bf16 = router_gate(x.astype(jnp.bfloat16), w, b)
    jax.block_until_ready(routed_bf16)
    assert routed_bf16.dtype == jnp.float32
    assert jnp.allclose(routed_bf16, ref, atol=2e-2, rtol=2e-2)
    assert jnp.allclose(jnp.sum(routed_bf16, axis=-1), 1.0, atol=1e-3)

    print("KERNEL_OK")
</pallas_src>

<mosaic_0001>
module attributes {stable_mosaic.version = 11 : i64} {
  func.func @_router_gate_kernel(%arg0: i32, %arg1: memref<8x32xf32, #tpu.memory_space<vmem>>, %arg2: memref<32x8xf32, #tpu.memory_space<vmem>>, %arg3: memref<1x8xf32, #tpu.memory_space<vmem>>, %arg4: memref<8x8xf32, #tpu.memory_space<vmem>>) attributes {dimension_semantics = [#tpu.dimension_semantics<parallel>], iteration_bounds = array<i64: 2>, scalar_prefetch = 0 : i64, scratch_operands = 0 : i64, tpu.core_type = #tpu.core_type<tc>, window_params = [{transform_indices = @transform_0, window_bounds = array<i64: 8, 32>}, {pipeline_mode = #tpu.pipeline_mode<synchronous>, transform_indices = @transform_1, window_bounds = array<i64: 32, 8>}, {pipeline_mode = #tpu.pipeline_mode<synchronous>, transform_indices = @transform_2, window_bounds = array<i64: 1, 8>}, {transform_indices = @transform_3, window_bounds = array<i64: 8, 8>}]} {
    %c0 = arith.constant 0 : index
    %c0_0 = arith.constant 0 : index
    %0 = vector.load %arg1[%c0, %c0_0] : memref<8x32xf32, #tpu.memory_space<vmem>>, vector<8x32xf32>
    %c0_1 = arith.constant 0 : index
    %c0_2 = arith.constant 0 : index
    %1 = vector.load %arg2[%c0_1, %c0_2] : memref<32x8xf32, #tpu.memory_space<vmem>>, vector<32x8xf32>
    %cst = arith.constant dense<0.000000e+00> : vector<8x8xf32>
    %2 = tpu.matmul %0, %1, %cst {dimension_numbers = #tpu.dot_dimension_numbers<[1], [0], [0], [1], [0, 0, 1, 1], [], []>} : vector<8x32xf32>, vector<32x8xf32>, vector<8x8xf32> -> vector<8x8xf32>
    %c0_3 = arith.constant 0 : index
    %c0_4 = arith.constant 0 : index
    %3 = vector.load %arg3[%c0_3, %c0_4] : memref<1x8xf32, #tpu.memory_space<vmem>>, vector<1x8xf32>
    %4 = vector.broadcast %3 : vector<1x8xf32> to vector<8x8xf32>
    %5 = arith.addf %2, %4 : vector<8x8xf32>
    %cst_5 = arith.constant dense<0xFF800000> : vector<8xf32>
    %6 = vector.multi_reduction <maximumf>, %5, %cst_5 [1] : vector<8x8xf32> to vector<8xf32>
    %7 = vector.shape_cast %6 : vector<8xf32> to vector<8x1xf32>
    %8 = vector.broadcast %7 : vector<8x1xf32> to vector<8x8xf32>
    %9 = arith.subf %5, %8 : vector<8x8xf32>
    %10 = math.exp %9 : vector<8x8xf32>
    %cst_6 = arith.constant dense<0.000000e+00> : vector<8xf32>
    %11 = vector.multi_reduction <add>, %10, %cst_6 [1] : vector<8x8xf32> to vector<8xf32>
    %12 = vector.shape_cast %11 : vector<8xf32> to vector<8x1xf32>
    %13 = vector.broadcast %12 : vector<8x1xf32> to vector<8x8xf32>
    %14 = arith.divf %10, %13 : vector<8x8xf32>
    %c0_7 = arith.constant 0 : index
    %c0_8 = arith.constant 0 : index
    %15 = vector.load %arg4[%c0_7, %c0_8] : memref<8x8xf32, #tpu.memory_space<vmem>>, vector<8x8xf32>
    tpu.vector_store %arg4[%c0_7, %c0_8], %14 {strides = array<i32>} : memref<8x8xf32, #tpu.memory_space<vmem>>, vector<8x8xf32>,
    return
  }
  func.func @transform_0(%arg0: i32) -> (i32, i32) {
    %c0_i32 = arith.constant 0 : i32
    %c0_i32_0 = arith.constant 0 : i32
    return %arg0, %c0_i32 : i32, i32
  }
  func.func @transform_1(%arg0: i32) -> (i32, i32) {
    %c0_i32 = arith.constant 0 : i32
    %c0_i32_0 = arith.constant 0 : i32
    %c0_i32_1 = arith.constant 0 : i32
    return %c0_i32, %c0_i32_0 : i32, i32
  }
  func.func @transform_2(%arg0: i32) -> (i32, i32) {
    %c0_i32 = arith.constant 0 : i32
    %c0_i32_0 = arith.constant 0 : i32
    %c0_i32_1 = arith.constant 0 : i32
    return %c0_i32, %c0_i32_0 : i32, i32
  }
  func.func @transform_3(%arg0: i32) -> (i32, i32) {
    %c0_i32 = arith.constant 0 : i32
    %c0_i32_0 = arith.constant 0 : i32
    return %arg0, %c0_i32 : i32, i32
  }
}

</mosaic_0001>

<bundles_post_ra>
// kernel: router_gate.1
= control target key start
LH: loop header
LB: loop body
LE: loop exit
PB: predicated region body
PF: predicated region fallthrough
CT: control target
= control target key end

     0   :  { %8 = vsyncpa [#allocation3], 0  ;;  %s624_s0 = inlined_call_operand.vmem [shape: f32[16,32], index: 0, kind: input, shape index: {}]   ;;  %s625_s1 = inlined_call_operand.vmem [shape: f32[32,8], index: 1, kind: input, shape index: {}]   ;;  %s626_s2 = inlined_call_operand.vmem [shape: f32[1,8], index: 2, kind: input, shape index: {}]   ;;  %s627_s3 = inlined_call_operand.hbm [shape: f32[16,8], index: 3, kind: output, shape index: {}]  }
   0x1   :  { %10 = vsyncpa [#allocation3 + $0x1], 0  ;;  %s506_s12 = smov 0   ;;  %s508_s13 = smov 0  }
   0x2   :  { %s510_s14 = smov 0   ;;  %s512_s15 = smov 0  }
   0x3 LB: > { %s527_s16 = sadd.s32 4294967295, %s480_s15   ;;  %s338_s17 = sadd.s32 4294967294, %s480_s15   ;;  %s480_s15 = sphi %s512_s15, %s633_s15   ;;  %s476_s14 = sphi %s510_s14, %s632_s14   ;;  %s472_s13 = sphi %s508_s13, %s631_s13   ;;  %s468_s12 = sphi %s506_s12, %s630_s12  }
   0x4   : > { %s531_s18 = sadd.s32 1, %s480_s15   ;;  %s91_s19 = sadd.s32 1, %s476_s14 }
   0x5   : > { %s88_s20 = ssub.s32 %s480_s15, %s531_s18  ;;  %p101_p0 = scmp.ne.s32.totalorder %s476_s14, %s472_s13 }
   0x6   : > { %p89_p1 = scmp.eq.s32.totalorder %s88_s20, 0  ;;  %p102_p2 = scmp.eq.s32.totalorder %s527_s16, 1 }
   0x7   : > { %p107_p3 = scmp.ne.s32.totalorder %s472_s13, %s468_s12  ;;  %p108_p4 = scmp.eq.s32.totalorder %s338_s17, 1 }
   0x8   : > { %s542_s21 = scalar_select %p89_p1, %s476_s14, %s91_s19  }
   0x9   : > { %p544_p5 = por %p102_p2, %p101_p0  ;;  %p548_p6 = por %p108_p4, %p107_p3 }
   0xa   : > { %p341_p7 = scmp.ge.s32.totalorder %s480_s15, 1  ;;  %p139_p8 = scmp.lt.s32.totalorder %s480_s15, 3 }
   0xc   : > { %p140_p9 = pnand %p341_p7, %p139_p8 }
   0xd   : > { %v167_v0 = vld [vmem:[%s625_s1] sm:$0xff] (!%p140_p9)  ;;  %v168_v1 = vld [vmem:[%s625_s1 + $0x8] sm:$0xff] (!%p140_p9)  ;;  %v169_v2 = vld [vmem:[%s625_s1 + $0x10] sm:$0xff] (!%p140_p9)  ;;  %v482_v3 = vmov (!%p140_p9), 0.0|0.0   ;;  %vm483_vm0 = vmmov (!%p140_p9), 0   ;;  %v484_v6 = vmov (!%p140_p9), 0.0  }
   0xe   : > { %143 = sbr.rel (%p140_p9) target bundleno = 568 (0x238), region = 32  ;;  %366 = vmatprep.subr.bf16.mxu0 (!%p140_p9), %v482_v3  ;;  %v367_v4 = vpack.c.bf16 (!%p140_p9), %v168_v1, %v167_v0  ;;  %v170_v5 = vld [vmem:[%s625_s1 + $0x18] sm:$0xff] (!%p140_p9)  ;;  %363 = vmatprep.mubr.msk.f32.mxu0 (!%p140_p9), %vm483_vm0, %v484_v6  ;;  %p162_p10 = scmp.lt.s32.totalorder (!%p140_p9), %s527_s16, 1  ;;  %vm178_vm1 = vcmask (!%p140_p9), 261120   ;;  %v344_v9 = vld [vmem:[%s626_s2] ss:$0 sm:$0xff] (!%p140_p9) }
   0xf   : > { %v370_v7 = vpack.c.bf16 (!%p140_p9), %v170_v5, %v169_v2  ;;  %vm252_vm2 = vcmask (!%p140_p9), 64512   ;;  %s159_s17 = sand.u32 (!%p140_p9), 1, %s472_s13   ;;  %s347_s20 = sshll.u32 (!%p140_p9), %s527_s16, 7 }
  0x10   : > { %368 = vmatpush3.bf16.msra.mxu0 (!%p140_p9), %v367_v4  ;;  %s342_s19 = sshll.u32 (!%p140_p9), %s159_s17, 3  ;;  %s581_s28 = scalar_lea.hbm (!%p140_p9), %s627_s3, %s347_s20 }
  0x11   : > { %369 = vmatprep.subr.bf16.mxu0 (!%p140_p9), %v482_v3  ;;  %s161_s24 = scalar_lea.vmem (!%p140_p9), [#allocation2], %s342_s19  ;;  %s266_s29 = scalar_lea.sflag (!%p140_p9), [#allocation3], %s159_s17 }
  0x12   : > { %s279_s25 = sshll.u32 (!%p140_p9), %s161_s24, 4  ;;  %s583_s25 = int_to_ptr.vmem [resolvable:$true] %s279_s25 }
  0x13   : > { %s418_s30 = scalar_lea.vmem (!%p140_p9), %s583_s25, 128 }
  0x14   : > { %371 = vmatpush3.bf16.msra.mxu0 (!%p140_p9), %v370_v7  ;;  %p419_p11 = scmp.ne.s32.totalorder (!%p140_p9), %s583_s25, %s418_s30 }
  0x15   : > { %s163_s5 = scalar_select %p162_p10, %s527_s16, 1 }
  0x16   : > { %p420_p12 = pnand %p419_p11, %p544_p5  ;;  %s485_s16 = smov [#allocation2]  }
  0x17   : > { %s343_s6 = sshll.u32 %s163_s5, 3  ;;  %s422_s4 = sshll.u32 %s485_s16, 4  ;;  %s423_s4 = int_to_ptr.vmem [resolvable:$false] %s422_s4 }
  0x18   : > { %s165_s9 = scalar_lea.vmem %s624_s0, %s343_s6  ;;  %p421_p13 = pneg %p420_p12 }
  0x19   : > { %v166_v8 = vld [vmem:[%s165_s9] sm:$0xff]  ;;  %s424_s5 = scalar_lea.vmem %s423_s4, 256  ;;  %p425_p0 = scmp.lt.s32.totalorder %s583_s25, %s423_s4 }
  0x1a   : > { %364 = vmatmul.mubr.msk.f32.vlgmr.msra.gmra.mrb[0].mxu0 %vm178_vm1, %v166_v8  ;;  %p426_p1 = scmp.lt.s32.totalorder %s424_s5, %s418_s30 }
  0x1c   : > { %p427_p2 = por %p426_p1, %p425_p0 }
  0x1e   : > { %p428_p3 = pnand %p427_p2, %p421_p13 }
  0xed   : > { %v248_v10 = vpop.f32.mrb[0].mxu0 }
  0xee   : > { %v249_v11 = vadd.f32 %v344_v9, %v248_v10  ;;  %v365_v12 = vpop.f32.mrb[1].mxu0 }
  0xf0   : > { %v253_v13 = vsel %vm252_vm2, %v249_v11, -inf }
  0xf1   : > { %254 = vmax.xlane.f32.xlu0 %v253_v13 }
 0x17e   : > { %v255_v14 = vpop.xlane.xlu0 %254 }
 0x17f   : > { %v256_v15 = vsub.f32 %v249_v11, %v255_v14 }
 0x181   : > { %v257_v16 = vmul.f32 1.442695, %v256_v15 }
 0x183   : > { %414 = vpow2.f32 %v257_v16 }
 0x18d   : > { %v415_v17 = vpop.eup %414 }
 0x18e   : > { %v259_v18 = vsel %vm252_vm2, %v415_v17, 0.0 }
 0x18f   : > { %260 = vadd.xlane.f32.xlu0 %v259_v18 }
 0x21c   : > { %v261_v19 = vpop.xlane.xlu0 %260 }
 0x21d   : > { %416 = vrcp.f32 %v261_v19 }
 0x227   : > { %v417_v20 = vpop.eup %416 }
 0x228   : > { %v263_v21 = vmul.f32 %v417_v20, %v415_v17 }
 0x22a   : > { %264 = vst.msk [vmem:[%s161_s24] sm:$0xff] %vm252_vm2, %v263_v21 }
 0x22b   : > { %431 = shalt.err (!%p428_p3)
}
 0x22c   : > { %s432_s6 = scalar_lea.hbm %s581_s28, 128  ;;  %s436_s9 = scalar_lea.hbm %s627_s3, 256 }
 0x22d   : > { %p433_p4 = scmp.ne.s32.totalorder %s581_s28, %s432_s6  ;;  %p437_p9 = scmp.lt.u32.totalorder %s581_s28, %s627_s3 }
 0x22e   : > { %p438_p10 = scmp.lt.u32.totalorder %s436_s9, %s432_s6  ;;  %p440_p12 = scmp.lt.u32.totalorder %s432_s6, %s581_s28 }
 0x22f   : > { %p434_p7 = pnand %p433_p4, %p544_p5 }
 0x230   : > { %p439_p11 = por %p438_p10, %p437_p9 }
 0x231   : > { %p435_p8 = pneg %p434_p7 }
 0x232   : > { %p441_p13 = por %p440_p12, %p439_p11 }
 0x234   : > { %p442_p0 = pnand %p441_p13, %p435_p8 }
 0x236   : > { %445 = shalt.err (!%p442_p0)
}
 0x237   : > { %372 = dma.vmem_to_hbm [thread:$0]  (%p544_p5), %s583_s25, 128, %s581_s28, %s266_s29  }
 0x238 PF: > { %p378_p1 = scmp.ge.s32.totalorder %s480_s15, 2  ;;  %s291_s17 = sand.u32 1, %s468_s12  }
 0x239   : > { %s292_s19 = scalar_lea.sflag [#allocation3], %s291_s17 }
 0x23a   : > { %p375_p2 = pnand %p378_p1, %p548_p6 }
 0x23c   : > { %463 = dma.done.wait (!%p375_p2), %s292_s19, 128  }
 0x23d   : > { %465 = vsyncadd (!%p375_p2), %s292_s19, 4294967168  ;;  %p13_p3 = scmp.ge.s32.totalorder %s531_s18, 4   ;;  %s630_s12 = smov %s472_s13 }
 0x23e   : > { %s631_s13 = smov %s476_s14  ;;  %s632_s14 = smov %s542_s21 }
 0x23f   : > { %s633_s15 = smov %s531_s18  ;;  %15 = sbr.rel (!%p13_p3) target bundleno = 3 (0x3), region = 67 }
 0x246   :  { %297 = vsyncpa [#allocation3], 1 }
 0x247   :  { %299 = vsyncpa [#allocation3 + $0x1], 1 }

</bundles_post_ra>
